<compile_context>
chip_gen: v5e
topology: v5e:2x2
jax: 0.10.0
libtpu: 0.0.40
codegen_flags: <defaults>
</compile_context>

<pallas_src>
import functools

import jax
import jax.numpy as jnp
import numpy as np
from jax.experimental import pallas as pl
from jax.experimental.pallas import tpu as pltpu

_EPS = 1e-8          # torch.nn.CosineSimilarity default eps
_TINY = 1e-37        # keeps rsqrt finite; far below any eps-relevant scale
_MIN_PALLAS_D = 128  # below this the per-row reductions are XLU-bound -> XLA
_STEP_INPUT_BYTES = 8 << 20  # target native input bytes per grid step


def _round_up(a, b):
    return (a + b - 1) // b * b


def _vmem_capacity_bytes():
    try:
        return int(pltpu.get_tpu_info().vmem_capacity_bytes)
    except Exception:
        return 64 << 20  # conservative default: v7x per-TensorCore VMEM


def _budget_step_bytes(vmem_cap):
    # Per-grid-step VMEM budget (double-buffered native inputs + f32 temps).
    return min(int(0.5 * vmem_cap), 48 << 20)


def _vmem_limit_bytes(step_bytes, vmem_cap):
    # Device-aware ceiling: never request more than capacity minus headroom.
    return int(min(max(32 << 20, step_bytes + (8 << 20)), vmem_cap - (8 << 20)))


def _clamped_inv_norms(nx2, ny2):
    # torch: dot / max(||x||*||y||, eps)
    #      == dot * min(rsqrt(||x||^2) * rsqrt(||y||^2), 1/eps)
    # Separate rsqrts (EUP slot) avoid f32 overflow of nx2 * ny2.
    inv = jax.lax.rsqrt(jnp.maximum(nx2, jnp.float32(_TINY))) * \
          jax.lax.rsqrt(jnp.maximum(ny2, jnp.float32(_TINY)))
    return jnp.minimum(inv, jnp.float32(1.0 / _EPS))


# ---------------------------------------------------------------------------
# Same-shape path: x, y flattened to (rows, D); 1-D grid over row tiles.
# ---------------------------------------------------------------------------
def _rows_kernel(x_ref, y_ref, o_ref, *, lane_dense):
    x = x_ref[...].astype(jnp.float32)
    y = y_ref[...].astype(jnp.float32)
    dot = jnp.sum(x * y, axis=-1)   # (T,)
    nx2 = jnp.sum(x * x, axis=-1)
    ny2 = jnp.sum(y * y, axis=-1)
    res = dot * _clamped_inv_norms(nx2, ny2)
    if lane_dense:
        o_ref[...] = res[None, :].astype(o_ref.dtype)   # (1, T): dense lanes
    else:
        o_ref[...] = res[:, None].astype(o_ref.dtype)   # (T, 1): column (large-D regime)


def _plan_row_tiles(rows, per_row_bytes, native_row_bytes, budget, max_tile_rows):
    cap = budget // per_row_bytes
    cap = min(cap, max(1, _STEP_INPUT_BYTES // max(native_row_bytes, 1)))
    if max_tile_rows is not None:
        cap = min(cap, int(max_tile_rows))
    cap = max(cap, 1)
    # Small problems: one exact tile (no ragged edge, no extra steps). Larger
    # ones: >= 2 tiles, even count, so v7x's two TensorCores split the work
    # (costs < 1 us of per-step overhead on single-TC v5e/v6e).
    if rows <= cap and rows * native_row_bytes <= _STEP_INPUT_BYTES:
        return rows, True
    if cap >= 128:
        granule, lane_dense = 128, True     # lane-dense output blocks
    else:
        granule, lane_dense = 8, False      # huge D: 8-row tiles, column output
    cap_g = max(granule, (cap // granule) * granule)
    num = max(2, pl.cdiv(rows, cap_g))
    num += num % 2                          # even tile count for 2-TC balance
    tile = min(cap_g, _round_up(pl.cdiv(rows, num), granule))
    return max(tile, granule), lane_dense


def _cosine_rows_pallas(x2, y2, out_dtype, max_tile_rows=None):
    rows, D = x2.shape
    vmem_cap = _vmem_capacity_bytes()
    budget = _budget_step_bytes(vmem_cap)
    d_pad = _round_up(D, 128)                     # lane padding in VMEM
    itemsum = x2.dtype.itemsize + y2.dtype.itemsize
    native_row = d_pad * itemsum                  # one native copy of both inputs
    per_row = 2 * native_row + 3 * d_pad * 4      # 2 pipeline buffers + f32 temps
    if 8 * per_row > budget:
        # TODO(synk): add a second "arbitrary" grid axis over D with f32 VMEM
        # accumulators for the (rare) D where even an 8-row tile overflows VMEM.
        return None

    tile_rows, lane_dense = _plan_row_tiles(rows, per_row, native_row, budget,
                                            max_tile_rows)
    num_tiles = pl.cdiv(rows, tile_rows)
    kernel = functools.partial(_rows_kernel, lane_dense=lane_dense)

    if lane_dense:
        out_shape = jax.ShapeDtypeStruct((1, rows), out_dtype)
        out_spec = pl.BlockSpec((1, tile_rows), lambda i: (0, i))
    else:
        out_shape = jax.ShapeDtypeStruct((rows, 1), out_dtype)
        out_spec = pl.BlockSpec((tile_rows, 1), lambda i: (i, 0))

    # Ragged edge: the last block's input DMA is clipped to the array bounds
    # (padding rows hold stale VMEM data); the garbage results land only in
    # output positions beyond `rows`, which Pallas masks on writeback.
    step_bytes = tile_rows * per_row
    out = pl.pallas_call(
        kernel,
        out_shape=out_shape,
        grid_spec=pltpu.PrefetchScalarGridSpec(
            num_scalar_prefetch=0,
            grid=(num_tiles,),
            in_specs=[
                pl.BlockSpec((tile_rows, D), lambda i: (i, 0)),
                pl.BlockSpec((tile_rows, D), lambda i: (i, 0)),
            ],
            out_specs=out_spec,
        ),
        compiler_params=pltpu.CompilerParams(
            dimension_semantics=("parallel",),
            vmem_limit_bytes=_vmem_limit_bytes(step_bytes, vmem_cap),
        ),
    )(x2, y2)
    return out.reshape(-1)


# ---------------------------------------------------------------------------
# Leading-dim broadcast path: big is (B_outer, rows_small, D), small is
# (rows_small, D) and stays VMEM-resident (constant block index).
# ---------------------------------------------------------------------------
def _bcast_kernel(big_ref, small_ref, o_ref):
    xb = big_ref[...].astype(jnp.float32)             # (TB, RS, D)
    ys = small_ref[...].astype(jnp.float32)[None]     # (1,  RS, D)
    dot = jnp.sum(xb * ys, axis=-1)                   # (TB, RS)
    nx2 = jnp.sum(xb * xb, axis=-1)                   # (TB, RS)
    ny2 = jnp.sum(ys * ys, axis=-1)                   # (1,  RS)
    o_ref[...] = (dot * _clamped_inv_norms(nx2, ny2)).astype(o_ref.dtype)


def _cosine_bcast_pallas(big3, small2, out_dtype):
    b_outer, rows_small, D = big3.shape
    vmem_cap = _vmem_capacity_bytes()
    budget = _budget_step_bytes(vmem_cap)
    d_pad = _round_up(D, 128)
    rs_pad = _round_up(rows_small, 8)
    # Resident small operand (native + f32 working copy) + per-batch-row cost
    # of the streamed big operand (double-buffered native + f32 temps).
    small_bytes = rs_pad * d_pad * (small2.dtype.itemsize + 4)
    per_b = rs_pad * d_pad * (2 * big3.dtype.itemsize + 3 * 4)
    if small_bytes > budget // 2 or small_bytes + per_b > budget:
        return None  # small operand too big to keep resident -> XLA fallback

    cap = (budget - small_bytes) // per_b
    cap = min(cap, max(1, _STEP_INPUT_BYTES // max(rs_pad * d_pad * big3.dtype.itemsize, 1)))
    if b_outer <= cap:
        tile_b = b_outer
    else:
        if cap < 8:
            return None
        tile_b = max(8, (cap // 8) * 8)
        num = max(2, pl.cdiv(b_outer, tile_b))
        num += num % 2
        tile_b = max(8, min(tile_b, _round_up(pl.cdiv(b_outer, num), 8)))
    num_tiles = pl.cdiv(b_outer, tile_b)

    step_bytes = small_bytes + tile_b * per_b
    out = pl.pallas_call(
        _bcast_kernel,
        out_shape=jax.ShapeDtypeStruct((b_outer, rows_small), out_dtype),
        grid_spec=pltpu.PrefetchScalarGridSpec(
            num_scalar_prefetch=0,
            grid=(num_tiles,),
            in_specs=[
                pl.BlockSpec((tile_b, rows_small, D), lambda i: (i, 0, 0)),
                # Un-broadcast operand: constant block index -> fetched once,
                # reused across every batch tile (broadcast never hits HBM).
                pl.BlockSpec((rows_small, D), lambda i: (0, 0)),
            ],
            out_specs=pl.BlockSpec((tile_b, rows_small), lambda i: (i, 0)),
        ),
        compiler_params=pltpu.CompilerParams(
            dimension_semantics=("parallel",),
            vmem_limit_bytes=_vmem_limit_bytes(step_bytes, vmem_cap),
        ),
    )(big3, small2)
    return out.reshape(-1)


# ---------------------------------------------------------------------------
# Wrapper / dispatch.
# ---------------------------------------------------------------------------
def _cosine_xla(x, y, out_dtype):
    xf = x.astype(jnp.float32)
    yf = y.astype(jnp.float32)
    dot = jnp.sum(xf * yf, axis=-1)
    nx = jnp.sqrt(jnp.sum(xf * xf, axis=-1))
    ny = jnp.sqrt(jnp.sum(yf * yf, axis=-1))
    return (dot / jnp.maximum(nx * ny, _EPS)).astype(out_dtype)


def _strip_leading_ones(shape):
    i = 0
    while i < len(shape) and shape[i] == 1:
        i += 1
    return tuple(shape[i:])


def _suffix_broadcast(x, y, bshape):
    """Detect a pure leading-dim broadcast: returns (big, small, small_core_shape)."""
    for big, small in ((x, y), (y, x)):
        if tuple(big.shape) != tuple(bshape):
            continue
        core = _strip_leading_ones(small.shape)
        if len(core) >= 1 and core == tuple(bshape[len(bshape) - len(core):]):
            return big, small, core
    return None


@functools.partial(jax.jit, static_argnames=("max_tile_rows",))
def cosine_similarity(x, y, *, max_tile_rows=None):
    """Equivalent of Similarity()(x, y) == F.cosine_similarity(x, y, dim=-1)."""
    out_dtype = jnp.result_type(x.dtype, y.dtype)
    if not jnp.issubdtype(out_dtype, jnp.floating):
        out_dtype = jnp.float32

    bshape = jnp.broadcast_shapes(x.shape, y.shape)
    D = bshape[-1]
    batch_shape = bshape[:-1]
    rows = int(np.prod(batch_shape)) if batch_shape else 1
    if rows == 0 or D == 0:
        return jnp.zeros(batch_shape, out_dtype)

    # Small D: three cross-lane reductions per row make this XLU-bound (and
    # heavily lane-padded) rather than HBM-bound -> let XLA handle it.
    # TODO(synk): pack 128//D rows per 128-lane register for 8 <= D < 128.
    if D < _MIN_PALLAS_D:
        return _cosine_xla(x, y, out_dtype)

    if x.shape == y.shape:
        res = _cosine_rows_pallas(x.reshape(rows, D), y.reshape(rows, D),
                                  out_dtype, max_tile_rows)
        if res is not None:
            return res.reshape(batch_shape)
        return _cosine_xla(x, y, out_dtype)

    sb = _suffix_broadcast(x, y, bshape)
    if sb is not None:
        big, small, core = sb
        rows_small = int(np.prod(core[:-1])) if len(core) > 1 else 1
        b_outer = rows // rows_small
        res = _cosine_bcast_pallas(big.reshape(b_outer, rows_small, D),
                                   small.reshape(rows_small, D), out_dtype)
        if res is not None:
            return res.reshape(batch_shape)

    # Interior broadcasting (both operands expanded / size-1 middle dims) or an
    # un-tileable corner case: correctness first, no HBM-materialized broadcast.
    # TODO(synk): express interior broadcasts in the index_map as well.
    return _cosine_xla(x, y, out_dtype)


def _reference(x, y):
    xb, yb = jnp.broadcast_arrays(x.astype(jnp.float32), y.astype(jnp.float32))
    dot = jnp.sum(xb * yb, axis=-1)
    nx = jnp.sqrt(jnp.sum(xb * xb, axis=-1))
    ny = jnp.sqrt(jnp.sum(yb * yb, axis=-1))
    return dot / jnp.maximum(nx * ny, _EPS)


if __name__ == "__main__":
    key = jax.random.PRNGKey(0)
    k1, k2, k3, k4, k5 = jax.random.split(key, 5)

    # 1) Module-style call: batch of sequence embeddings (single exact tile).
    B, S, H = 2, 8, 256
    x = jax.random.normal(k1, (B, S, H), dtype=jnp.float32)
    y = jax.random.normal(k2, (B, S, H), dtype=jnp.float32)
    out = jax.block_until_ready(cosine_similarity(x, y))
    assert out.shape == (B, S), out.shape
    np.testing.assert_allclose(np.asarray(out), np.asarray(_reference(x, y)),
                               rtol=1e-5, atol=1e-5)

    # 2) Leading-dim broadcast (y lacks the batch dim): BlockSpec broadcast
    #    path — y is DMA'd into VMEM once, never materialized in HBM.
    y_b = jax.random.normal(k3, (S, H), dtype=jnp.float32)
    out2 = jax.block_until_ready(cosine_similarity(x, y_b))
    assert out2.shape == (B, S), out2.shape
    np.testing.assert_allclose(np.asarray(out2), np.asarray(_reference(x, y_b)),
                               rtol=1e-5, atol=1e-5)

    # 3) Multi-tile path with a ragged edge block (forced small tile).
    xa = jax.random.normal(k4, (3, 100, H), dtype=jnp.float32)
    ya = jax.random.normal(k5, (3, 100, H), dtype=jnp.float32)
    out3 = jax.block_until_ready(cosine_similarity(xa, ya, max_tile_rows=128))
    assert out3.shape == (3, 100), out3.shape
    np.testing.assert_allclose(np.asarray(out3), np.asarray(_reference(xa, ya)),
                               rtol=1e-5, atol=1e-5)

    # 4) Small hidden dim (XLU-bound regime): exercises the XLA fallback path.
    xs = jax.random.normal(k1, (B, S, 32), dtype=jnp.float32)
    ys = jax.random.normal(k2, (B, S, 32), dtype=jnp.float32)
    out4 = jax.block_until_ready(cosine_similarity(xs, ys))
    np.testing.assert_allclose(np.asarray(out4), np.asarray(_reference(xs, ys)),
                               rtol=1e-5, atol=1e-5)

    print("KERNEL_OK")
</pallas_src>

<mosaic_0001>
module attributes {stable_mosaic.version = 11 : i64} {
  func.func @_rows_kernel(%arg0: i32, %arg1: memref<16x256xf32, #tpu.memory_space<vmem>>, %arg2: memref<16x256xf32, #tpu.memory_space<vmem>>, %arg3: memref<1x16xf32, #tpu.memory_space<vmem>>) attributes {dimension_semantics = [#tpu.dimension_semantics<parallel>], iteration_bounds = array<i64: 1>, scalar_prefetch = 0 : i64, scratch_operands = 0 : i64, tpu.core_type = #tpu.core_type<tc>, window_params = [{transform_indices = @transform_0, window_bounds = array<i64: 16, 256>}, {transform_indices = @transform_1, window_bounds = array<i64: 16, 256>}, {transform_indices = @transform_2, window_bounds = array<i64: 1, 16>}]} {
    %c0 = arith.constant 0 : index
    %c0_0 = arith.constant 0 : index
    %0 = vector.load %arg1[%c0, %c0_0] : memref<16x256xf32, #tpu.memory_space<vmem>>, vector<16x256xf32>
    %c0_1 = arith.constant 0 : index
    %c0_2 = arith.constant 0 : index
    %1 = vector.load %arg2[%c0_1, %c0_2] : memref<16x256xf32, #tpu.memory_space<vmem>>, vector<16x256xf32>
    %2 = arith.mulf %0, %1 : vector<16x256xf32>
    %cst = arith.constant dense<0.000000e+00> : vector<16xf32>
    %3 = vector.multi_reduction <add>, %2, %cst [1] : vector<16x256xf32> to vector<16xf32>
    %4 = arith.mulf %0, %0 : vector<16x256xf32>
    %cst_3 = arith.constant dense<0.000000e+00> : vector<16xf32>
    %5 = vector.multi_reduction <add>, %4, %cst_3 [1] : vector<16x256xf32> to vector<16xf32>
    %6 = arith.mulf %1, %1 : vector<16x256xf32>
    %cst_4 = arith.constant dense<0.000000e+00> : vector<16xf32>
    %7 = vector.multi_reduction <add>, %6, %cst_4 [1] : vector<16x256xf32> to vector<16xf32>
    %cst_5 = arith.constant 9.99999991E-38 : f32
    %8 = vector.broadcast %cst_5 : f32 to vector<16xf32>
    %9 = arith.maximumf %5, %8 : vector<16xf32>
    %10 = math.rsqrt %9 : vector<16xf32>
    %cst_6 = arith.constant 9.99999991E-38 : f32
    %11 = vector.broadcast %cst_6 : f32 to vector<16xf32>
    %12 = arith.maximumf %7, %11 : vector<16xf32>
    %13 = math.rsqrt %12 : vector<16xf32>
    %14 = arith.mulf %10, %13 : vector<16xf32>
    %cst_7 = arith.constant 1.000000e+08 : f32
    %15 = vector.broadcast %cst_7 : f32 to vector<16xf32>
    %16 = arith.minimumf %14, %15 : vector<16xf32>
    %17 = arith.mulf %3, %16 : vector<16xf32>
    %18 = vector.shape_cast %17 : vector<16xf32> to vector<1x16xf32>
    %c0_8 = arith.constant 0 : index
    %c0_9 = arith.constant 0 : index
    %19 = vector.load %arg3[%c0_8, %c0_9] : memref<1x16xf32, #tpu.memory_space<vmem>>, vector<1x16xf32>
    tpu.vector_store %arg3[%c0_8, %c0_9], %18 {strides = array<i32>} : memref<1x16xf32, #tpu.memory_space<vmem>>, vector<1x16xf32>,
    return
  }
  func.func @transform_0(%arg0: i32) -> (i32, i32) {
    %c0_i32 = arith.constant 0 : i32
    %c0_i32_0 = arith.constant 0 : i32
    return %arg0, %c0_i32 : i32, i32
  }
  func.func @transform_1(%arg0: i32) -> (i32, i32) {
    %c0_i32 = arith.constant 0 : i32
    %c0_i32_0 = arith.constant 0 : i32
    return %arg0, %c0_i32 : i32, i32
  }
  func.func @transform_2(%arg0: i32) -> (i32, i32) {
    %c0_i32 = arith.constant 0 : i32
    %c0_i32_0 = arith.constant 0 : i32
    return %c0_i32, %arg0 : i32, i32
  }
}

</mosaic_0001>

<bundles_post_ra>
// kernel: cosine_similarity.1
= control target key start
LH: loop header
LB: loop body
LE: loop exit
PB: predicated region body
PF: predicated region fallthrough
CT: control target
= control target key end

     0   :  { %7 = vsyncpa [#allocation3], 0  ;;  %s241_s0 = inlined_call_operand.hbm [shape: f32[16,256], index: 0, kind: input, shape index: {}]   ;;  %s242_s1 = inlined_call_operand.hbm [shape: f32[16,256], index: 1, kind: input, shape index: {}]   ;;  %s243_s2 = inlined_call_operand.vmem [shape: f32[1,16], index: 2, kind: output, shape index: {}]  }
   0x1   :  { %s13_s11 = sshll.u32 %s241_s0, 4  ;;  %s14_s11 = int_to_ptr.hbm [resolvable:$true] %s13_s11 }
   0x2   :  { %8 = vsyncpa [#allocation5], 0  ;;  %s213_s12 = smov [#allocation2]   ;;  %s26_s16 = sshll.u32 %s242_s1, 4  ;;  %s27_s16 = int_to_ptr.hbm [resolvable:$true] %s26_s16 }
   0x3   :  { %s15_s13 = sshll.u32 %s213_s12, 4  ;;  %s214_s17 = smov 256   ;;  %s16_s13 = int_to_ptr.vmem [resolvable:$true] %s15_s13 }
   0x4   :  { %s215_s18 = smov 16   ;;  %s216_s19 = smov [#allocation4]  }
   0x5   :  { %21 = dma.hbm_to_vmem [thread:$0]  %s14_s11, 512, %s16_s13, [#allocation3], %s214_s17, %s214_s17, %s215_s18  }
   0x6   :  { %s28_s20 = sshll.u32 %s216_s19, 4  ;;  %s29_s20 = int_to_ptr.vmem [resolvable:$true] %s28_s20 }
   0x7   :  { %34 = dma.hbm_to_vmem [thread:$0]  %s27_s16, 512, %s29_s20, [#allocation5], %s214_s17, %s214_s17, %s215_s18  }
   0x8   :  { %209 = dma.done.wait [#allocation3], 512  }
   0x9   :  { %210 = vsyncadd [#allocation3], 4294966784 }
   0xa   :  { %211 = dma.done.wait [#allocation5], 512  }
   0xb   :  { %212 = vsyncadd [#allocation5], 4294966784  ;;  %v47_v0 = vld [vmem:[#allocation4] sm:$0xff]  ;;  %v48_v1 = vld [vmem:[#allocation4 + $0x8] sm:$0xff]  ;;  %v133_v60 = vlaneseq  ;;  %vm138_vm12 = vcmask 130112   ;;  %vm141_vm13 = vcmask 122880  }
   0xc   :  { %v43_v2 = vld [vmem:[#allocation2] sm:$0xff]  ;;  %v71_v3 = vmul.f32 %v47_v0, %v47_v0  ;;  %v72_v4 = vmul.f32 %v48_v1, %v48_v1  ;;  %v44_v5 = vld [vmem:[#allocation2 + $0x8] sm:$0xff]  ;;  %v49_v9 = vld [vmem:[#allocation4 + $0x10] sm:$0xff] }
   0xd   :  { %v61_v6 = vmul.f32 %v43_v2, %v43_v2  ;;  %v51_v7 = vmul.f32 %v47_v0, %v43_v2  ;;  %v62_v8 = vmul.f32 %v44_v5, %v44_v5  ;;  %v50_v10 = vld [vmem:[#allocation4 + $0x18] sm:$0xff]  ;;  %v45_v11 = vld [vmem:[#allocation2 + $0x10] sm:$0xff]  ;;  %v52_v12 = vmul.f32 %v48_v1, %v44_v5 }
   0xe   :  { %v75_v13 = vadd.f32 %v72_v4, %v71_v3  ;;  %v46_v14 = vld [vmem:[#allocation2 + $0x18] sm:$0xff]  ;;  %v73_v17 = vmul.f32 %v49_v9, %v49_v9  ;;  %v74_v18 = vmul.f32 %v50_v10, %v50_v10  ;;  %v63_v19 = vmul.f32 %v45_v11, %v45_v11 }
   0xf   :  { %v65_v15 = vadd.f32 %v62_v8, %v61_v6  ;;  %v55_v16 = vadd.f32 %v52_v12, %v51_v7  ;;  %v64_v20 = vmul.f32 %v46_v14, %v46_v14  ;;  %v53_v21 = vmul.f32 %v49_v9, %v45_v11 }
  0x10   :  { %76 = vadd.xlane.f32.xlu1 %v75_v13  ;;  %v54_v22 = vmul.f32 %v50_v10, %v46_v14  ;;  %v78_v23 = vadd.f32 %v74_v18, %v73_v17  ;;  %v134_v2 = vand.u32 127, %v133_v60 }
  0x11   :  { %66 = vadd.xlane.f32.xlu0 %v65_v15  ;;  %56 = vadd.xlane.f32.xlu2 %v55_v16  ;;  %v68_v24 = vadd.f32 %v64_v20, %v63_v19 }
  0x12   :  { %v58_v25 = vadd.f32 %v54_v22, %v53_v21  ;;  %v136_v7 = vadd.s32 4294967288, %v134_v2 }
  0x18   :  { %79 = vadd.xlane.f32.xlu1 %v78_v23 }
  0x19   :  { %69 = vadd.xlane.f32.xlu0 %v68_v24  ;;  %59 = vadd.xlane.f32.xlu2 %v58_v25 }
  0x83   :  { %v77_v26 = vpop.xlane.xlu1 %76 }
  0x84   :  { %v103_v27 = vmax.f32 %v77_v26, 1e-37  ;;  %v67_v28 = vpop.xlane.xlu0 %66  ;;  %v57_v54 = vpop.xlane.xlu2 %56 }
  0x85   :  { %v81_v29 = vmax.f32 %v67_v28, 1e-37 }
  0x86   :  { %153 = vrsqrt.f32 %v103_v27  ;;  %vm111_vm2 = vweird.f32 %v103_v27 }
  0x87   :  { %155 = vrsqrt.f32 %v81_v29  ;;  %vm89_vm4 = vweird.f32 %v81_v29 }
  0x8b   :  { %v80_v30 = vpop.xlane.xlu1 %79 }
  0x8c   :  { %v154_v31 = vpop.eup %153  ;;  %v104_v32 = vmax.f32 %v80_v30, 1e-37  ;;  %v70_v33 = vpop.xlane.xlu0 %69 }
  0x8d   :  { %v156_v34 = vpop.eup %155  ;;  %v106_v35 = vmul.f32 %v154_v31, %v103_v27  ;;  %v82_v36 = vmax.f32 %v70_v33, 1e-37  ;;  %vm112_vm0 = vweird.f32 %v154_v31  ;;  %v60_v4 = vpop.xlane.xlu2 %59 }
  0x8e   :  { %v84_v37 = vmul.f32 %v156_v34, %v81_v29  ;;  %157 = vrsqrt.f32 %v104_v32  ;;  %vm90_vm1 = vweird.f32 %v156_v34  ;;  %vm113_vm3 = vmor %vm111_vm2, %vm112_vm0  ;;  %vm121_vm8 = vweird.f32 %v104_v32 }
  0x8f   :  { %v107_v38 = vmul.f32 %v154_v31, %v106_v35  ;;  %159 = vrsqrt.f32 %v82_v36  ;;  %vm91_vm5 = vmor %vm89_vm4, %vm90_vm1  ;;  %vm99_vm10 = vweird.f32 %v82_v36 }
  0x90   :  { %v85_v39 = vmul.f32 %v156_v34, %v84_v37 }
  0x91   :  { %v108_v40 = vmul.f32 0.5, %v107_v38 }
  0x92   :  { %v86_v41 = vmul.f32 0.5, %v85_v39 }
  0x93   :  { %v109_v42 = vsub.f32 1.5, %v108_v40 }
  0x94   :  { %v158_v43 = vpop.eup %157  ;;  %v87_v44 = vsub.f32 1.5, %v86_v41 }
  0x95   :  { %v160_v45 = vpop.eup %159  ;;  %v116_v46 = vmul.f32 %v158_v43, %v104_v32  ;;  %v110_v47 = vmul.f32 %v154_v31, %v109_v42  ;;  %vm122_vm6 = vweird.f32 %v158_v43 }
  0x96   :  { %v94_v48 = vmul.f32 %v160_v45, %v82_v36  ;;  %v88_v49 = vmul.f32 %v156_v34, %v87_v44  ;;  %vm100_vm7 = vweird.f32 %v160_v45  ;;  %vm123_vm9 = vmor %vm121_vm8, %vm122_vm6 }
  0x97   :  { %v117_v50 = vmul.f32 %v158_v43, %v116_v46  ;;  %v114_v53 = vsel %vm113_vm3, %v154_v31, %v110_v47  ;;  %vm101_vm11 = vmor %vm99_vm10, %vm100_vm7 }
  0x98   :  { %v95_v51 = vmul.f32 %v160_v45, %v94_v48  ;;  %v92_v52 = vsel %vm91_vm5, %v156_v34, %v88_v49 }
  0x99   :  { %v118_v55 = vmul.f32 0.5, %v117_v50  ;;  %v125_v58 = vmul.f32 %v114_v53, %v92_v52 }
  0x9a   :  { %v96_v56 = vmul.f32 0.5, %v95_v51 }
  0x9b   :  { %v119_v57 = vsub.f32 1.5, %v118_v55  ;;  %v127_v63 = vmin.f32 %v125_v58, 1e+08 }
  0x9c   :  { %v97_v59 = vsub.f32 1.5, %v96_v56 }
  0x9d   :  { %v120_v61 = vmul.f32 %v158_v43, %v119_v57  ;;  %v129_v5 = vmul.f32 %v127_v63, %v57_v54 }
  0x9e   :  { %v98_v62 = vmul.f32 %v160_v45, %v97_v59 }
  0x9f   :  { %v124_v0 = vsel %vm123_vm9, %v158_v43, %v120_v61  ;;  %v135_v9 = vperm.slane %v129_v5, %v134_v2 }
  0xa0   :  { %v102_v1 = vsel %vm101_vm11, %v160_v45, %v98_v62 }
  0xa1   :  { %v126_v3 = vmul.f32 %v124_v0, %v102_v1 }
  0xa3   :  { %v128_v6 = vmin.f32 %v126_v3, 1e+08 }
  0xa5   :  { %v130_v8 = vmul.f32 %v128_v6, %v60_v4 }
  0xa7   :  { %v137_v10 = vperm.slane %v130_v8, %v136_v7 }
  0xa9   :  { %v139_v11 = vsel %vm138_vm12, %v137_v10, %v135_v9 }
  0xaa   :  { %142 = vst.msk [vmem:[%s243_s2] sm:$0x1] %vm141_vm13, %v139_v11 }
  0xab   :  { %147 = vsyncpa [#allocation3], 1 }
  0xac   :  { %148 = vsyncpa [#allocation5], 1 }

</bundles_post_ra>
